<compile_context>
chip_gen: v5e
topology: v5e:2x2
jax: 0.10.0
libtpu: 0.0.40
codegen_flags: <defaults>
</compile_context>

<pallas_src>
import functools

import jax
import jax.numpy as jnp
from jax.experimental import pallas as pl
from jax.experimental.pallas import tpu as pltpu


def _round_up(x, m):
    return ((x + m - 1) // m) * m


def _vmem_budget():
    """Return (working_set_budget_bytes, vmem_limit_bytes) per TPU generation.

    v5e/v6e: 128 MiB VMEM per TensorCore -> big blocks, raised scoped limit.
    v7x: 64 MiB per core -> keep pred blocks ~<=4 MiB and the limit <=48 MiB
    so double-buffered inputs + f32 temporaries never spill.  Falls back to
    the conservative (v7x-safe) numbers if the hardware query fails.
    """
    try:
        cap = int(pltpu.get_tpu_info().vmem_capacity_bytes)
    except Exception:
        cap = 64 * 1024 * 1024
    if cap >= 100 * 1024 * 1024:                  # v5e / v6e
        return 40 * 1024 * 1024, 80 * 1024 * 1024
    return 20 * 1024 * 1024, 48 * 1024 * 1024     # v7x / unknown


def _choose_block_n(n_rows, num_classes, pred_dtype):
    """Row tile sized purely from a VMEM working-set budget (no row cap)."""
    itemsize = int(jnp.dtype(pred_dtype).itemsize)
    # Packed dtypes (bf16/fp16) use a (16, 128) sublane tile.
    align = 8 if itemsize >= 4 else 16
    c_pad = _round_up(num_classes, 128)           # lane-padded class width
    # Per-row VMEM bytes of one grid step:
    #   pred tile (double-buffered, DMA dtype, lane-padded)
    #   ~4x full-width f32 temporaries (x cast, x-m, exp, iota==label select)
    #   label + out tiles: (block_n, 1) lane-pads to block_n x 128 x 4 B, x2
    per_row = (2 * c_pad * itemsize) + (4 * c_pad * 4) + 2 * (2 * 128 * 4)
    budget, vmem_limit = _vmem_budget()
    rows = max(align, (budget // per_row) // align * align)
    rows = min(rows, _round_up(n_rows, align))
    return rows, vmem_limit


def _label_smoothing_kernel(pred_ref, label_ref, loss_ref, *,
                            smooth_val, confidence):
    # pred_ref:  (TN, C) logits block (any float dtype; compute in f32)
    # label_ref: (TN, 1) int32 class indices in [0, C)
    # loss_ref:  (TN, 1) per-row loss (f32)
    x = pred_ref[...].astype(jnp.float32)                          # (TN, C)
    lab = label_ref[...]                                           # (TN, 1)

    # Stable logsumexp along the class (lane) axis.
    m = jnp.max(x, axis=-1, keepdims=True)                         # (TN, 1)
    lse = m + jnp.log(jnp.sum(jnp.exp(x - m), axis=-1, keepdims=True))

    # x[label] via an iota==label mask (no scatter, no full-width w tensor).
    iota = jax.lax.broadcasted_iota(jnp.int32, x.shape, 1)         # (TN, C)
    x_lab = jnp.sum(jnp.where(iota == lab, x, 0.0),
                    axis=-1, keepdims=True)                        # (TN, 1)
    sum_x = jnp.sum(x, axis=-1, keepdims=True)                     # (TN, 1)

    # sum(w) == 1  =>  loss = lse - sum(w*x)
    #                       = lse - smooth*sum(x) - (conf-smooth)*x[label]
    loss = lse - smooth_val * sum_x - (confidence - smooth_val) * x_lab
    loss_ref[...] = loss.astype(loss_ref.dtype)


def label_smoothing_loss(pred, label, *, num_classes, smoothing=0.0,
                         reduction='mean', loss_weight=1.0,
                         weight=None, avg_factor=None,
                         reduction_override=None, block_n=None):
    """Pallas implementation of LabelSmoothingLoss.forward.

    pred:  (N, C) float logits (f32 / bf16 / f16).
    label: (N,)   integer class indices in [0, C).
    """
    assert reduction_override in (None, 'none', 'mean', 'sum')
    reduction = reduction_override if reduction_override else reduction

    N, C = pred.shape
    assert C == num_classes
    assert num_classes >= 2, "LabelSmoothingLoss needs num_classes >= 2"

    confidence = 1.0 - smoothing
    smooth_val = smoothing / (num_classes - 1)
    label2d = label.reshape(N, 1).astype(jnp.int32)

    auto_block_n, vmem_limit = _choose_block_n(N, C, pred.dtype)
    if block_n is None:
        block_n = auto_block_n
    else:
        align = 8 if jnp.dtype(pred.dtype).itemsize >= 4 else 16
        block_n = max(align, (block_n // align) * align)
    grid = (pl.cdiv(N, block_n),)

    kernel = functools.partial(
        _label_smoothing_kernel,
        smooth_val=float(smooth_val),
        confidence=float(confidence),
    )

    itemsize = int(jnp.dtype(pred.dtype).itemsize)
    cost = pl.CostEstimate(
        flops=6 * N * C,
        transcendentals=N * C,                      # exp per element
        bytes_accessed=N * C * itemsize + N * 4 + N * 4,
    )

    per_row = pl.pallas_call(
        kernel,
        out_shape=jax.ShapeDtypeStruct((N, 1), jnp.float32),
        grid_spec=pltpu.PrefetchScalarGridSpec(
            num_scalar_prefetch=0,
            grid=grid,
            in_specs=[
                pl.BlockSpec((block_n, C), lambda i: (i, 0)),
                pl.BlockSpec((block_n, 1), lambda i: (i, 0)),
            ],
            out_specs=pl.BlockSpec((block_n, 1), lambda i: (i, 0)),
        ),
        compiler_params=pltpu.CompilerParams(
            dimension_semantics=("parallel",),
            vmem_limit_bytes=int(vmem_limit),
        ),
        cost_estimate=cost,
    )(pred, label2d)

    loss = per_row[:, 0]                                           # (N,)

    # weight_reduce_loss semantics (plain-JAX scalar glue).
    if weight is not None:
        loss = loss * weight.astype(jnp.float32)
    if avg_factor is None:
        if reduction == 'mean':
            loss = jnp.mean(loss)
        elif reduction == 'sum':
            loss = jnp.sum(loss)
        # 'none' -> leave per-element
    else:
        if reduction == 'mean':
            loss = jnp.sum(loss) / avg_factor
        elif reduction != 'none':
            raise ValueError('avg_factor can not be used with reduction="sum"')
    return loss_weight * loss


def _reference_per_row(pred, label, num_classes, smoothing):
    """Pure-JAX per-row reference mirroring the PyTorch module."""
    logp = jax.nn.log_softmax(pred.astype(jnp.float32), axis=-1)
    smooth_val = smoothing / (num_classes - 1)
    onehot = jax.nn.one_hot(label, num_classes, dtype=jnp.float32)
    true_dist = jnp.where(onehot > 0, 1.0 - smoothing, smooth_val)
    return jnp.sum(-true_dist * logp, axis=-1)


if __name__ == "__main__":
    key = jax.random.PRNGKey(0)
    k_pred, k_lab = jax.random.split(key)

    # Small shapes; N deliberately NOT a multiple of 8/16 to exercise edge
    # clipping on the last (only) block.
    N, C = 20, 10
    smoothing = 0.1
    loss_weight = 1.0

    pred = jax.random.normal(k_pred, (N, C), dtype=jnp.float32)
    label = jax.random.randint(k_lab, (N,), 0, C, dtype=jnp.int32)

    # f32, mean reduction
    out = label_smoothing_loss(pred, label, num_classes=C, smoothing=smoothing,
                               reduction='mean', loss_weight=loss_weight)
    out = jax.block_until_ready(out)
    ref = loss_weight * jnp.mean(_reference_per_row(pred, label, C, smoothing))
    assert jnp.allclose(out, ref, atol=1e-5, rtol=1e-5), (out, ref)

    # bf16 input, 'none' reduction (per-row); kernel computes in f32 internally.
    pred_bf16 = pred.astype(jnp.bfloat16)
    out_none = jax.block_until_ready(
        label_smoothing_loss(pred_bf16, label, num_classes=C,
                             smoothing=smoothing, reduction='none'))
    ref_none = _reference_per_row(pred_bf16, label, C, smoothing)
    assert out_none.shape == (N,)
    assert jnp.allclose(out_none, ref_none, atol=1e-5, rtol=1e-5), (
        out_none, ref_none)

    # sum reduction with per-row weights exercises the epilogue glue.
    w = jnp.linspace(0.5, 1.5, N, dtype=jnp.float32)
    out_sum = jax.block_until_ready(
        label_smoothing_loss(pred, label, num_classes=C, smoothing=smoothing,
                             reduction='sum', weight=w))
    ref_sum = jnp.sum(_reference_per_row(pred, label, C, smoothing) * w)
    assert jnp.allclose(out_sum, ref_sum, atol=1e-4, rtol=1e-5), (out_sum, ref_sum)

    print("KERNEL_OK")
</pallas_src>

<mosaic_0001>
module attributes {stable_mosaic.version = 11 : i64} {
  func.func @_label_smoothing_kernel(%arg0: i32, %arg1: memref<24x10xf32, #tpu.memory_space<vmem>>, %arg2: memref<24x1xi32, #tpu.memory_space<vmem>>, %arg3: memref<24x1xf32, #tpu.memory_space<vmem>>) attributes {dimension_semantics = [#tpu.dimension_semantics<parallel>], iteration_bounds = array<i64: 1>, scalar_prefetch = 0 : i64, scratch_operands = 0 : i64, tpu.core_type = #tpu.core_type<tc>, window_params = [{transform_indices = @transform_0, window_bounds = array<i64: 24, 10>}, {transform_indices = @transform_1, window_bounds = array<i64: 24, 1>}, {transform_indices = @transform_2, window_bounds = array<i64: 24, 1>}]} {
    %c0 = arith.constant 0 : index
    %c0_0 = arith.constant 0 : index
    %0 = vector.load %arg1[%c0, %c0_0] : memref<24x10xf32, #tpu.memory_space<vmem>>, vector<24x10xf32>
    %c0_1 = arith.constant 0 : index
    %c0_2 = arith.constant 0 : index
    %1 = vector.load %arg2[%c0_1, %c0_2] : memref<24x1xi32, #tpu.memory_space<vmem>>, vector<24x1xi32>
    %cst = arith.constant dense<0xFF800000> : vector<24xf32>
    %2 = vector.multi_reduction <maximumf>, %0, %cst [1] : vector<24x10xf32> to vector<24xf32>
    %3 = vector.shape_cast %2 : vector<24xf32> to vector<24x1xf32>
    %4 = vector.broadcast %3 : vector<24x1xf32> to vector<24x10xf32>
    %5 = arith.subf %0, %4 : vector<24x10xf32>
    %6 = math.exp %5 : vector<24x10xf32>
    %cst_3 = arith.constant dense<0.000000e+00> : vector<24xf32>
    %7 = vector.multi_reduction <add>, %6, %cst_3 [1] : vector<24x10xf32> to vector<24xf32>
    %8 = vector.shape_cast %7 : vector<24xf32> to vector<24x1xf32>
    %9 = math.log %8 : vector<24x1xf32>
    %10 = arith.addf %3, %9 : vector<24x1xf32>
    %11 = tpu.iota {dimensions = array<i32: 1>} : vector<24x10xi32>
    %12 = vector.broadcast %1 : vector<24x1xi32> to vector<24x10xi32>
    %13 = arith.cmpi eq, %11, %12 : vector<24x10xi32>
    %cst_4 = arith.constant 0.000000e+00 : f32
    %14 = vector.broadcast %cst_4 : f32 to vector<24x10xf32>
    %15 = arith.select %13, %0, %14 : vector<24x10xi1>, vector<24x10xf32>
    %cst_5 = arith.constant dense<0.000000e+00> : vector<24xf32>
    %16 = vector.multi_reduction <add>, %15, %cst_5 [1] : vector<24x10xf32> to vector<24xf32>
    %17 = vector.shape_cast %16 : vector<24xf32> to vector<24x1xf32>
    %cst_6 = arith.constant dense<0.000000e+00> : vector<24xf32>
    %18 = vector.multi_reduction <add>, %0, %cst_6 [1] : vector<24x10xf32> to vector<24xf32>
    %19 = vector.shape_cast %18 : vector<24xf32> to vector<24x1xf32>
    %cst_7 = arith.constant 0.0111111114 : f32
    %20 = vector.broadcast %cst_7 : f32 to vector<24x1xf32>
    %21 = arith.mulf %20, %19 : vector<24x1xf32>
    %22 = arith.subf %10, %21 : vector<24x1xf32>
    %cst_8 = arith.constant 0.888888895 : f32
    %23 = vector.broadcast %cst_8 : f32 to vector<24x1xf32>
    %24 = arith.mulf %23, %17 : vector<24x1xf32>
    %25 = arith.subf %22, %24 : vector<24x1xf32>
    %c0_9 = arith.constant 0 : index
    %c0_10 = arith.constant 0 : index
    %26 = vector.load %arg3[%c0_9, %c0_10] : memref<24x1xf32, #tpu.memory_space<vmem>>, vector<24x1xf32>
    tpu.vector_store %arg3[%c0_9, %c0_10], %25 {strides = array<i32>} : memref<24x1xf32, #tpu.memory_space<vmem>>, vector<24x1xf32>,
    return
  }
  func.func @transform_0(%arg0: i32) -> (i32, i32) {
    %c0_i32 = arith.constant 0 : i32
    %c0_i32_0 = arith.constant 0 : i32
    return %arg0, %c0_i32 : i32, i32
  }
  func.func @transform_1(%arg0: i32) -> (i32, i32) {
    %c0_i32 = arith.constant 0 : i32
    %c0_i32_0 = arith.constant 0 : i32
    return %arg0, %c0_i32 : i32, i32
  }
  func.func @transform_2(%arg0: i32) -> (i32, i32) {
    %c0_i32 = arith.constant 0 : i32
    %c0_i32_0 = arith.constant 0 : i32
    return %arg0, %c0_i32 : i32, i32
  }
}

</mosaic_0001>

<bundles_post_ra>
// kernel: tpu_custom_call.1
= control target key start
LH: loop header
LB: loop body
LE: loop exit
PB: predicated region body
PF: predicated region fallthrough
CT: control target
= control target key end

     0   :  { %vm17_vm0 = vcmask 80896   ;;  %v125_v2 = vmov 0   ;;  %v54_v20 = vlaneseq  ;;  %vm101_vm4 = vcmask 7168   ;;  %s184_s0 = inlined_call_operand.vmem [shape: f32[20,10], index: 0, kind: input, shape index: {}]   ;;  %s185_s1 = inlined_call_operand.vmem [shape: s32[20,1], index: 1, kind: input, shape index: {}]   ;;  %s186_s2 = inlined_call_operand.vmem [shape: f32[20,1], index: 2, kind: output, shape index: {}]  }
   0x1   :  { %v11_v0 = vld [vmem:[%s184_s0] sm:$0xff]  ;;  %v13_v1 = vld [vmem:[%s184_s0 + $0x10] sm:$0xff]  ;;  %110 = vset.pattern.permute.xlu1 %v125_v2  ;;  %111 = vset.pattern.permute.xlu2 %v125_v2  ;;  %v15_v5 = vld [vmem:[%s185_s1 + $0x8] sm:$0xff] }
   0x2   :  { %v18_v3 = vsel %vm17_vm0, %v11_v0, -inf  ;;  %v24_v4 = vsel %vm17_vm0, %v13_v1, -inf  ;;  %112 = vset.pattern.permute.xlu0 %v125_v2  ;;  %60 = vperm.xlu2 %111, %v15_v5   ;;  %v12_v6 = vld [vmem:[%s184_s0 + $0x8] sm:$0xff]  ;;  %v16_v8 = vld [vmem:[%s185_s1 + $0x10] sm:$0xff]  ;;  %v14_v9 = vld [vmem:[%s185_s1] sm:$0xff]  ;;  %v55_v22 = vand.u32 127, %v54_v20 }
   0x3   :  { %19 = vmax.xlane.f32.xlu0 %v18_v3  ;;  %25 = vmax.xlane.f32.xlu1 %v24_v4  ;;  %v21_v7 = vsel %vm17_vm0, %v12_v6, -inf  ;;  %v83_v10 = vsel %vm17_vm0, %v12_v6, 0.0  ;;  %v80_v24 = vsel %vm17_vm0, %v11_v0, 0.0  ;;  %v86_v30 = vsel %vm17_vm0, %v13_v1, 0.0 }
   0xa   :  { %63 = vperm.xlu2 %111, %v16_v8  }
   0xb   :  { %22 = vmax.xlane.f32.xlu0 %v21_v7 }
  0x1c   :  { %57 = vperm.xlu1 %110, %v14_v9  }
  0x46   :  { %84 = vadd.xlane.f32.xlu1 %v83_v10 }
  0x5c   :  { %v61_v14 = vpop.permute.xlu2 %60 }
  0x5d   :  { %vm66_vm3 = vcmp.eq.s32.totalorder %v55_v22, %v61_v14 }
  0x5e   :  { %v69_v37 = vsel %vm66_vm3, %v12_v6, 0.0 }
  0x5f   :  { %v74_v38 = vsel %vm17_vm0, %v69_v37, 0.0 }
  0x64   :  { %v64_v23 = vpop.permute.xlu2 %63 }
  0x65   :  { %vm67_vm1 = vcmp.eq.s32.totalorder %v55_v22, %v64_v23 }
  0x66   :  { %v70_v29 = vsel %vm67_vm1, %v13_v1, 0.0 }
  0x67   :  { %v77_v31 = vsel %vm17_vm0, %v70_v29, 0.0 }
  0x76   :  { %v20_v11 = vpop.xlane.xlu0 %19  ;;  %v26_v21 = vpop.xlane.xlu1 %25 }
  0x77   :  { %v27_v12 = vsub.f32 %v11_v0, %v20_v11  ;;  %v29_v26 = vsub.f32 %v13_v1, %v26_v21 }
  0x79   :  { %v30_v13 = vmul.f32 1.442695, %v27_v12  ;;  %v34_v28 = vmul.f32 1.442695, %v29_v26 }
  0x7b   :  { %113 = vpow2.f32 %v30_v13 }
  0x7e   :  { %v163_v15 = vpop.xlane.xlu0 %22 }
  0x7f   :  { %v28_v16 = vsub.f32 %v12_v6, %v163_v15 }
  0x81   :  { %v114_v17 = vpop.eup %113  ;;  %v32_v18 = vmul.f32 1.442695, %v28_v16 }
  0x82   :  { %v36_v19 = vsel %vm17_vm0, %v114_v17, 0.0 }
  0x83   :  { %115 = vpow2.f32 %v32_v18  ;;  %37 = vadd.xlane.f32.xlu0 %v36_v19 }
  0x84   :  { %117 = vpow2.f32 %v34_v28 }
  0x89   :  { %v116_v25 = vpop.eup %115 }
  0x8a   :  { %v39_v27 = vsel %vm17_vm0, %v116_v25, 0.0  ;;  %v118_v32 = vpop.eup %117 }
  0x8b   :  { %81 = vadd.xlane.f32.xlu0 %v80_v24  ;;  %40 = vadd.xlane.f32.xlu2 %v39_v27  ;;  %v42_v34 = vsel %vm17_vm0, %v118_v32, 0.0 }
  0x8e   :  { %v58_v33 = vpop.permute.xlu1 %57 }
  0x8f   :  { %vm65_vm2 = vcmp.eq.s32.totalorder %v55_v22, %v58_v33 }
  0x90   :  { %v68_v35 = vsel %vm65_vm2, %v11_v0, 0.0 }
  0x91   :  { %v71_v36 = vsel %vm17_vm0, %v68_v35, 0.0 }
  0x93   :  { %87 = vadd.xlane.f32.xlu0 %v86_v30  ;;  %78 = vadd.xlane.f32.xlu2 %v77_v31 }
  0x9b   :  { %43 = vadd.xlane.f32.xlu0 %v42_v34 }
  0xa3   :  { %72 = vadd.xlane.f32.xlu0 %v71_v36 }
  0xab   :  { %75 = vadd.xlane.f32.xlu0 %v74_v38 }
  0xb9   :  { %v85_v57 = vpop.xlane.xlu1 %84 }
  0xba   :  { %v90_v63 = vmul.f32 0.011111111, %v85_v57 }
  0xf6   :  { %v38_v39 = vpop.xlane.xlu0 %37 }
  0xf7   :  { %119 = vlog2.f32 %v38_v39 }
  0xfd   :  { %v120_v43 = vpop.eup %119 }
  0xfe   :  { %v82_v40 = vpop.xlane.xlu0 %81  ;;  %v41_v42 = vpop.xlane.xlu2 %40  ;;  %v46_v45 = vmul.f32 0.6931472, %v120_v43 }
  0xff   :  { %121 = vlog2.f32 %v41_v42  ;;  %v89_v47 = vmul.f32 0.011111111, %v82_v40 }
 0x100   :  { %v51_v46 = vadd.f32 %v46_v45, %v20_v11 }
 0x102   :  { %v92_v53 = vsub.f32 %v51_v46, %v89_v47 }
 0x105   :  { %v122_v48 = vpop.eup %121 }
 0x106   :  { %v88_v41 = vpop.xlane.xlu0 %87  ;;  %v48_v52 = vmul.f32 0.6931472, %v122_v48  ;;  %v79_v54 = vpop.xlane.xlu2 %78 }
 0x107   :  { %v91_v56 = vmul.f32 0.011111111, %v88_v41  ;;  %v97_v61 = vmul.f32 0.8888889, %v79_v54 }
 0x108   :  { %v52_v62 = vadd.f32 %v48_v52, %v163_v15 }
 0x10a   :  { %v93_v2 = vsub.f32 %v52_v62, %v90_v63 }
 0x10e   :  { %v44_v44 = vpop.xlane.xlu0 %43 }
 0x10f   :  { %123 = vlog2.f32 %v44_v44 }
 0x115   :  { %v124_v49 = vpop.eup %123 }
 0x116   :  { %v50_v50 = vmul.f32 0.6931472, %v124_v49  ;;  %v73_v51 = vpop.xlane.xlu0 %72 }
 0x117   :  { %v95_v55 = vmul.f32 0.8888889, %v73_v51 }
 0x118   :  { %v53_v58 = vadd.f32 %v50_v50, %v26_v21 }
 0x119   :  { %v98_v59 = vsub.f32 %v92_v53, %v95_v55 }
 0x11a   :  { %v94_v60 = vsub.f32 %v53_v58, %v91_v56 }
 0x11b   :  { %102 = vst.msk [vmem:[%s186_s2] sm:$0xff] %vm101_vm4, %v98_v59 }
 0x11c   :  { %v100_v0 = vsub.f32 %v94_v60, %v97_v61 }
 0x11e   :  { %104 = vst.msk [vmem:[%s186_s2 + $0x10] sm:$0xff] %vm101_vm4, %v100_v0  ;;  %v76_v1 = vpop.xlane.xlu0 %75 }
 0x11f   :  { %v96_v3 = vmul.f32 0.8888889, %v76_v1 }
 0x121   :  { %v99_v4 = vsub.f32 %v93_v2, %v96_v3 }
 0x123   :  { %103 = vst.msk [vmem:[%s186_s2 + $0x8] sm:$0xff] %vm101_vm4, %v99_v4 }

</bundles_post_ra>
